<compile_context>
chip_gen: v7x
topology: tpu7x:2x2x1
jax: 0.10.0
libtpu: 0.0.40
codegen_flags: <defaults>
</compile_context>

<pallas_src>
import functools

import jax
import jax.numpy as jnp
from jax.experimental import pallas as pl
from jax.experimental.pallas import tpu as pltpu

K = 4                  # top-k segments (module default k=4)
LAMBDA_CENTER = 20.0   # module default lambda_center=20
EPS = 1e-8

# Contract both minor dims: (T, T) x (bb, T) -> (T, bb)   (flash-attn NT pattern)
_NT_DIMS = (((1,), (1,)), ((), ()))


def _transpose_via_mxu(s, eye_bf16):
    """Exact (bb, T) -> (T, bb) transpose via 3 bf16 identity matmuls (f32 acc)."""
    s1 = s.astype(jnp.bfloat16)
    r1 = s - s1.astype(jnp.float32)
    s2 = r1.astype(jnp.bfloat16)
    s3 = (r1 - s2.astype(jnp.float32)).astype(jnp.bfloat16)
    t1 = jax.lax.dot_general(eye_bf16, s1, _NT_DIMS, preferred_element_type=jnp.float32)
    t2 = jax.lax.dot_general(eye_bf16, s2, _NT_DIMS, preferred_element_type=jnp.float32)
    t3 = jax.lax.dot_general(eye_bf16, s3, _NT_DIMS, preferred_element_type=jnp.float32)
    return (t1 + t2) + t3


def dmil_center_kernel(pred_ref, tgt_ref, eye_ref, tri_ref, out_ref, *,
                       true_b, single_tile):
    # pred_ref: (bb, T) tile of predictions in natural layout (original dtype)
    # tgt_ref : (1, bb) float32 labels (garbage in out-of-range lanes -> masked)
    # eye_ref : (T, T) bf16 identity           (resident, constant index_map)
    # tri_ref : (T, T) bf16 strictly-lower tri (resident, constant index_map)
    # out_ref : SMEM (1, 1) final loss        [single-tile fast path]
    #           SMEM (1, 3) partials          [multi-tile: dmil, center, #normal]
    bb, T = pred_ref.shape
    i = pl.program_id(0)

    # Valid-sample mask for (possibly partial) last tile -- inputs are unpadded.
    n_valid = jnp.minimum(bb, true_b - i * bb)
    lane = jax.lax.broadcasted_iota(jnp.int32, (1, bb), 1)
    valid = lane < n_valid

    s = pred_ref[...].astype(jnp.float32)               # (bb, T), cast after DMA
    st = _transpose_via_mxu(s, eye_ref[...])            # (T, bb): batch on lanes

    y = tgt_ref[...]                                    # (1, bb)
    is_anom = y == 1.0
    is_norm = valid & (y == 0.0)

    tri = tri_ref[...]                                  # (T, T) strictly lower

    # ---- dynamic MIL loss: iterative top-k extraction (k static & small) ----
    vals = st                                           # same precision as m (f32)
    nll = jnp.zeros((1, bb), jnp.float32)
    for _ in range(K):
        m = jnp.max(vals, axis=0, keepdims=True)        # (1, bb) sublane reduce
        arg = jnp.where(is_anom, m, 1.0 - m) + EPS      # fold label select pre-log
        nll = nll - jnp.log(arg)                        # one EUP log per step
        is_max = vals == m
        # "First occurrence" tie-break on the idle MXU (torch.topk removes one dup).
        prefix = jnp.dot(tri, is_max.astype(jnp.bfloat16),
                         preferred_element_type=jnp.float32)
        first = is_max & (prefix < 0.5)
        vals = jnp.where(first, -1e30, vals)            # sigmoid outputs >> -1e30

    per_sample = nll * (1.0 / K)                        # (1, bb)
    dmil_p = jnp.sum(jnp.where(valid, per_sample, 0.0), axis=1, keepdims=True)

    # ---- center loss over normal samples (single pass: sum & sum of squares) ----
    col_sum = jnp.sum(st, axis=0, keepdims=True)        # (1, bb)
    col_sumsq = jnp.sum(st * st, axis=0, keepdims=True) # (1, bb)
    col_sq = col_sumsq - col_sum * col_sum * (1.0 / T)  # sum_t (s - mean)^2
    cen_p = jnp.sum(jnp.where(is_norm, col_sq, 0.0), axis=1, keepdims=True)
    n_norm = jnp.sum(jnp.where(is_norm, 1.0, 0.0), axis=1, keepdims=True)

    if single_tile:
        # Fast path: fold the final combine into the kernel (one SMEM scalar).
        dmil = dmil_p * (1.0 / true_b)
        center = jnp.where(n_norm > 0.0,
                           cen_p / jnp.maximum(n_norm * T, 1.0),
                           0.0)
        loss = dmil + LAMBDA_CENTER * center            # (1, 1)
        out_ref[0, 0] = loss[0, 0]
    else:
        out_ref[0, 0] = dmil_p[0, 0]
        out_ref[0, 1] = cen_p[0, 0]
        out_ref[0, 2] = n_norm[0, 0]


def _round_up(x, m):
    return ((x + m - 1) // m) * m


def _pick_block_b(B, T, block_b):
    # Cap by T so the (T, bb) f32 working set stays inside the vreg file (v5e).
    cap = 512 if T <= 16 else (256 if T <= 32 else 128)
    bb = max(128, min(block_b, cap))
    if B >= 256:
        # Guarantee >= 2 tiles so ("parallel",) can feed both v7x TensorCores.
        bb = min(bb, _round_up(pl.cdiv(B, 2), 128))
    if bb >= B:
        bb = B                       # single full-array tile, no padding needed
    return bb


@functools.partial(jax.jit, static_argnames=("block_b",))
def dmil_center_loss(predictions, targets, *, block_b=512):
    """predictions: (B, T) sigmoid anomaly scores; targets: (B,) labels (0/1)."""
    B, T = predictions.shape
    if K > T:
        raise ValueError(f"k={K} must be <= number of segments T={T}")

    bb = _pick_block_b(B, T, block_b)
    num_tiles = pl.cdiv(B, bb)
    single_tile = num_tiles == 1

    # Tiny label row (B floats); predictions pass through untouched in their
    # native (B, T) layout and dtype (bf16 stays bf16 for the HBM->VMEM DMA).
    tgt = targets.astype(jnp.float32).reshape(1, B)

    # (T, T) constants hoisted out of the kernel body; constant index_map means
    # they are DMA'd once and stay resident across grid steps.
    idx = jnp.arange(T, dtype=jnp.int32)
    eye = (idx[:, None] == idx[None, :]).astype(jnp.bfloat16)
    tri = (idx[:, None] > idx[None, :]).astype(jnp.bfloat16)   # strictly lower

    kernel = functools.partial(dmil_center_kernel, true_b=B,
                               single_tile=single_tile)
    out_shape = jax.ShapeDtypeStruct((1, 1) if single_tile else (num_tiles, 3),
                                     jnp.float32)
    out_block = (1, 1) if single_tile else (1, 3)
    out_idx = (lambda i: (0, 0)) if single_tile else (lambda i: (i, 0))

    out = pl.pallas_call(
        kernel,
        out_shape=out_shape,
        grid=(num_tiles,),
        in_specs=[
            pl.BlockSpec((bb, T), lambda i: (i, 0)),     # native layout, no copy
            pl.BlockSpec((1, bb), lambda i: (0, i)),
            pl.BlockSpec((T, T), lambda i: (0, 0)),      # eye, resident
            pl.BlockSpec((T, T), lambda i: (0, 0)),      # tri, resident
        ],
        out_specs=pl.BlockSpec(out_block, out_idx,
                               memory_space=pltpu.MemorySpace.SMEM),
        compiler_params=pltpu.CompilerParams(
            dimension_semantics=("parallel",)),          # megacore on v7x
    )(predictions, tgt, eye, tri)

    if single_tile:
        return out[0, 0]

    dmil = jnp.sum(out[:, 0]) / B
    n_norm = jnp.sum(out[:, 2])
    center = jnp.where(
        n_norm > 0.0,
        jnp.sum(out[:, 1]) / jnp.maximum(n_norm * T, 1.0),
        0.0,
    )
    return dmil + LAMBDA_CENTER * center


def dmil_center_loss_ref(predictions, targets):
    """Pure-JAX reference mirroring the PyTorch module."""
    B, T = predictions.shape
    topk = jnp.sort(predictions, axis=1)[:, ::-1][:, :K]            # (B, K)
    abn = jnp.mean(-jnp.log(topk + EPS), axis=1)
    nrm = jnp.mean(-jnp.log(1.0 - topk + EPS), axis=1)
    per_sample = jnp.where(targets == 1, abn, nrm)
    dmil = jnp.mean(per_sample)

    normal = (targets == 0)
    n_normal = jnp.sum(normal)
    centers = jnp.mean(predictions, axis=1, keepdims=True)
    sq = (predictions - centers) ** 2
    row_sum = jnp.sum(sq, axis=1)
    center = jnp.where(
        n_normal > 0,
        jnp.sum(jnp.where(normal, row_sum, 0.0)) / jnp.maximum(n_normal * T, 1),
        0.0,
    )
    return dmil + LAMBDA_CENTER * center


if __name__ == "__main__":
    key = jax.random.PRNGKey(0)
    k1, k2, k3, k4 = jax.random.split(key, 4)

    # Main small case (single-tile fast path): B=4 videos, T=16 segments.
    B, T = 4, 16
    predictions = jax.nn.sigmoid(jax.random.normal(k1, (B, T), dtype=jnp.float32))
    targets = jnp.array([0, 1, 0, 1], dtype=jnp.int32)
    loss = dmil_center_loss(predictions, targets)
    jax.block_until_ready(loss)
    ref = dmil_center_loss_ref(predictions, targets)
    assert jnp.allclose(loss, ref, rtol=1e-5, atol=1e-5), (loss, ref)

    # Multi-tile + partial last tile (B not a multiple of the lane tile).
    B2, T2 = 260, 16
    preds2 = jax.nn.sigmoid(jax.random.normal(k2, (B2, T2), dtype=jnp.float32))
    tgts2 = (jax.random.uniform(k3, (B2,)) > 0.5).astype(jnp.int32)
    loss2 = dmil_center_loss(preds2, tgts2)
    jax.block_until_ready(loss2)
    ref2 = dmil_center_loss_ref(preds2, tgts2)
    assert jnp.allclose(loss2, ref2, rtol=1e-5, atol=1e-5), (loss2, ref2)

    # All-anomalous edge case: center loss must be exactly 0.
    tgts3 = jnp.ones((B,), dtype=jnp.int32)
    loss3 = dmil_center_loss(predictions, tgts3)
    jax.block_until_ready(loss3)
    ref3 = dmil_center_loss_ref(predictions, tgts3)
    assert jnp.allclose(loss3, ref3, rtol=1e-5, atol=1e-5), (loss3, ref3)

    # bf16 predictions (no wrapper upcast), T=32, two full tiles on the grid.
    B4, T4 = 512, 32
    preds4 = jax.nn.sigmoid(
        jax.random.normal(k4, (B4, T4), dtype=jnp.float32)).astype(jnp.bfloat16)
    tgts4 = (jax.random.uniform(k3, (B4,)) > 0.5).astype(jnp.int32)
    loss4 = dmil_center_loss(preds4, tgts4)
    jax.block_until_ready(loss4)
    ref4 = dmil_center_loss_ref(preds4.astype(jnp.float32), tgts4)
    assert jnp.allclose(loss4, ref4, rtol=1e-5, atol=1e-5), (loss4, ref4)

    print("KERNEL_OK")
</pallas_src>

<mosaic_0001>
module attributes {stable_mosaic.version = 11 : i64} {
  func.func @dmil_center_kernel(%arg0: i32, %arg1: memref<4x16xf32, #tpu.memory_space<vmem>>, %arg2: memref<1x4xf32, #tpu.memory_space<vmem>>, %arg3: memref<16x16xbf16, #tpu.memory_space<vmem>>, %arg4: memref<16x16xbf16, #tpu.memory_space<vmem>>, %arg5: memref<1x1xf32, #tpu.memory_space<smem>>) attributes {dimension_semantics = [#tpu.dimension_semantics<parallel>], iteration_bounds = array<i64: 1>, scalar_prefetch = 0 : i64, scratch_operands = 0 : i64, tpu.core_type = #tpu.core_type<tc>, window_params = [{transform_indices = @transform_0, window_bounds = array<i64: 4, 16>}, {transform_indices = @transform_1, window_bounds = array<i64: 1, 4>}, {pipeline_mode = #tpu.pipeline_mode<synchronous>, transform_indices = @transform_2, window_bounds = array<i64: 16, 16>}, {pipeline_mode = #tpu.pipeline_mode<synchronous>, transform_indices = @transform_3, window_bounds = array<i64: 16, 16>}, {transform_indices = @transform_4, window_bounds = array<i64: 1, 1>}]} {
    %c4_i32 = arith.constant 4 : i32
    %0 = arith.muli %arg0, %c4_i32 : i32
    %c4_i32_0 = arith.constant 4 : i32
    %1 = arith.subi %c4_i32_0, %0 : i32
    %c4_i32_1 = arith.constant 4 : i32
    %2 = arith.minsi %c4_i32_1, %1 : i32
    %3 = tpu.iota {dimensions = array<i32: 1>} : vector<1x4xi32>
    %4 = vector.broadcast %2 : i32 to vector<1x4xi32>
    %5 = arith.cmpi slt, %3, %4 : vector<1x4xi32>
    %c0 = arith.constant 0 : index
    %c0_2 = arith.constant 0 : index
    %6 = vector.load %arg1[%c0, %c0_2] : memref<4x16xf32, #tpu.memory_space<vmem>>, vector<4x16xf32>
    %c0_3 = arith.constant 0 : index
    %c0_4 = arith.constant 0 : index
    %7 = vector.load %arg3[%c0_3, %c0_4] : memref<16x16xbf16, #tpu.memory_space<vmem>>, vector<16x16xbf16>
    %8 = arith.truncf %6 : vector<4x16xf32> to vector<4x16xbf16>
    %9 = arith.extf %8 : vector<4x16xbf16> to vector<4x16xf32>
    %10 = arith.subf %6, %9 : vector<4x16xf32>
    %11 = arith.truncf %10 : vector<4x16xf32> to vector<4x16xbf16>
    %12 = arith.extf %11 : vector<4x16xbf16> to vector<4x16xf32>
    %13 = arith.subf %10, %12 : vector<4x16xf32>
    %14 = arith.truncf %13 : vector<4x16xf32> to vector<4x16xbf16>
    %cst = arith.constant dense<0.000000e+00> : vector<16x4xf32>
    %15 = tpu.matmul %7, %8, %cst {dimension_numbers = #tpu.dot_dimension_numbers<[1], [1], [0], [0], [0, 0, 1, 0], [], []>} : vector<16x16xbf16>, vector<4x16xbf16>, vector<16x4xf32> -> vector<16x4xf32>
    %cst_5 = arith.constant dense<0.000000e+00> : vector<16x4xf32>
    %16 = tpu.matmul %7, %11, %cst_5 {dimension_numbers = #tpu.dot_dimension_numbers<[1], [1], [0], [0], [0, 0, 1, 0], [], []>} : vector<16x16xbf16>, vector<4x16xbf16>, vector<16x4xf32> -> vector<16x4xf32>
    %cst_6 = arith.constant dense<0.000000e+00> : vector<16x4xf32>
    %17 = tpu.matmul %7, %14, %cst_6 {dimension_numbers = #tpu.dot_dimension_numbers<[1], [1], [0], [0], [0, 0, 1, 0], [], []>} : vector<16x16xbf16>, vector<4x16xbf16>, vector<16x4xf32> -> vector<16x4xf32>
    %18 = arith.addf %15, %16 : vector<16x4xf32>
    %19 = arith.addf %18, %17 : vector<16x4xf32>
    %c0_7 = arith.constant 0 : index
    %c0_8 = arith.constant 0 : index
    %20 = vector.load %arg2[%c0_7, %c0_8] : memref<1x4xf32, #tpu.memory_space<vmem>>, vector<1x4xf32>
    %cst_9 = arith.constant 1.000000e+00 : f32
    %21 = vector.broadcast %cst_9 : f32 to vector<1x4xf32>
    %22 = arith.cmpf oeq, %20, %21 : vector<1x4xf32>
    %cst_10 = arith.constant 0.000000e+00 : f32
    %23 = vector.broadcast %cst_10 : f32 to vector<1x4xf32>
    %24 = arith.cmpf oeq, %20, %23 : vector<1x4xf32>
    %25 = arith.andi %5, %24 : vector<1x4xi1>
    %c0_11 = arith.constant 0 : index
    %c0_12 = arith.constant 0 : index
    %26 = vector.load %arg4[%c0_11, %c0_12] : memref<16x16xbf16, #tpu.memory_space<vmem>>, vector<16x16xbf16>
    %cst_13 = arith.constant 0.000000e+00 : f32
    %27 = vector.broadcast %cst_13 : f32 to vector<1x4xf32>
    %cst_14 = arith.constant dense<0xFF800000> : vector<4xf32>
    %28 = vector.multi_reduction <maximumf>, %19, %cst_14 [0] : vector<16x4xf32> to vector<4xf32>
    %29 = vector.shape_cast %28 : vector<4xf32> to vector<1x4xf32>
    %cst_15 = arith.constant 1.000000e+00 : f32
    %30 = vector.broadcast %cst_15 : f32 to vector<1x4xf32>
    %31 = arith.subf %30, %29 : vector<1x4xf32>
    %32 = arith.select %22, %29, %31 : vector<1x4xi1>, vector<1x4xf32>
    %cst_16 = arith.constant 9.99999993E-9 : f32
    %33 = vector.broadcast %cst_16 : f32 to vector<1x4xf32>
    %34 = arith.addf %32, %33 : vector<1x4xf32>
    %35 = math.log %34 : vector<1x4xf32>
    %36 = arith.subf %27, %35 : vector<1x4xf32>
    %37 = vector.broadcast %29 : vector<1x4xf32> to vector<16x4xf32>
    %38 = arith.cmpf oeq, %19, %37 : vector<16x4xf32>
    %39 = arith.extui %38 : vector<16x4xi1> to vector<16x4xi32>
    %40 = arith.sitofp %39 : vector<16x4xi32> to vector<16x4xf32>
    %41 = arith.truncf %40 : vector<16x4xf32> to vector<16x4xbf16>
    %cst_17 = arith.constant dense<0.000000e+00> : vector<16x4xf32>
    %42 = tpu.matmul %26, %41, %cst_17 {dimension_numbers = #tpu.dot_dimension_numbers<[1], [0], [0], [1], [0, 0, 1, 1], [], []>} : vector<16x16xbf16>, vector<16x4xbf16>, vector<16x4xf32> -> vector<16x4xf32>
    %cst_18 = arith.constant 5.000000e-01 : f32
    %43 = vector.broadcast %cst_18 : f32 to vector<16x4xf32>
    %44 = arith.cmpf olt, %42, %43 : vector<16x4xf32>
    %45 = arith.andi %38, %44 : vector<16x4xi1>
    %cst_19 = arith.constant -1.000000e+30 : f32
    %46 = vector.broadcast %cst_19 : f32 to vector<16x4xf32>
    %47 = arith.select %45, %46, %19 : vector<16x4xi1>, vector<16x4xf32>
    %cst_20 = arith.constant dense<0xFF800000> : vector<4xf32>
    %48 = vector.multi_reduction <maximumf>, %47, %cst_20 [0] : vector<16x4xf32> to vector<4xf32>
    %49 = vector.shape_cast %48 : vector<4xf32> to vector<1x4xf32>
    %cst_21 = arith.constant 1.000000e+00 : f32
    %50 = vector.broadcast %cst_21 : f32 to vector<1x4xf32>
    %51 = arith.subf %50, %49 : vector<1x4xf32>
    %52 = arith.select %22, %49, %51 : vector<1x4xi1>, vector<1x4xf32>
    %cst_22 = arith.constant 9.99999993E-9 : f32
    %53 = vector.broadcast %cst_22 : f32 to vector<1x4xf32>
    %54 = arith.addf %52, %53 : vector<1x4xf32>
    %55 = math.log %54 : vector<1x4xf32>
    %56 = arith.subf %36, %55 : vector<1x4xf32>
    %57 = vector.broadcast %49 : vector<1x4xf32> to vector<16x4xf32>
    %58 = arith.cmpf oeq, %47, %57 : vector<16x4xf32>
    %59 = arith.extui %58 : vector<16x4xi1> to vector<16x4xi32>
    %60 = arith.sitofp %59 : vector<16x4xi32> to vector<16x4xf32>
    %61 = arith.truncf %60 : vector<16x4xf32> to vector<16x4xbf16>
    %cst_23 = arith.constant dense<0.000000e+00> : vector<16x4xf32>
    %62 = tpu.matmul %26, %61, %cst_23 {dimension_numbers = #tpu.dot_dimension_numbers<[1], [0], [0], [1], [0, 0, 1, 1], [], []>} : vector<16x16xbf16>, vector<16x4xbf16>, vector<16x4xf32> -> vector<16x4xf32>
    %cst_24 = arith.constant 5.000000e-01 : f32
    %63 = vector.broadcast %cst_24 : f32 to vector<16x4xf32>
    %64 = arith.cmpf olt, %62, %63 : vector<16x4xf32>
    %65 = arith.andi %58, %64 : vector<16x4xi1>
    %cst_25 = arith.constant -1.000000e+30 : f32
    %66 = vector.broadcast %cst_25 : f32 to vector<16x4xf32>
    %67 = arith.select %65, %66, %47 : vector<16x4xi1>, vector<16x4xf32>
    %cst_26 = arith.constant dense<0xFF800000> : vector<4xf32>
    %68 = vector.multi_reduction <maximumf>, %67, %cst_26 [0] : vector<16x4xf32> to vector<4xf32>
    %69 = vector.shape_cast %68 : vector<4xf32> to vector<1x4xf32>
    %cst_27 = arith.constant 1.000000e+00 : f32
    %70 = vector.broadcast %cst_27 : f32 to vector<1x4xf32>
    %71 = arith.subf %70, %69 : vector<1x4xf32>
    %72 = arith.select %22, %69, %71 : vector<1x4xi1>, vector<1x4xf32>
    %cst_28 = arith.constant 9.99999993E-9 : f32
    %73 = vector.broadcast %cst_28 : f32 to vector<1x4xf32>
    %74 = arith.addf %72, %73 : vector<1x4xf32>
    %75 = math.log %74 : vector<1x4xf32>
    %76 = arith.subf %56, %75 : vector<1x4xf32>
    %77 = vector.broadcast %69 : vector<1x4xf32> to vector<16x4xf32>
    %78 = arith.cmpf oeq, %67, %77 : vector<16x4xf32>
    %79 = arith.extui %78 : vector<16x4xi1> to vector<16x4xi32>
    %80 = arith.sitofp %79 : vector<16x4xi32> to vector<16x4xf32>
    %81 = arith.truncf %80 : vector<16x4xf32> to vector<16x4xbf16>
    %cst_29 = arith.constant dense<0.000000e+00> : vector<16x4xf32>
    %82 = tpu.matmul %26, %81, %cst_29 {dimension_numbers = #tpu.dot_dimension_numbers<[1], [0], [0], [1], [0, 0, 1, 1], [], []>} : vector<16x16xbf16>, vector<16x4xbf16>, vector<16x4xf32> -> vector<16x4xf32>
    %cst_30 = arith.constant 5.000000e-01 : f32
    %83 = vector.broadcast %cst_30 : f32 to vector<16x4xf32>
    %84 = arith.cmpf olt, %82, %83 : vector<16x4xf32>
    %85 = arith.andi %78, %84 : vector<16x4xi1>
    %cst_31 = arith.constant -1.000000e+30 : f32
    %86 = vector.broadcast %cst_31 : f32 to vector<16x4xf32>
    %87 = arith.select %85, %86, %67 : vector<16x4xi1>, vector<16x4xf32>
    %cst_32 = arith.constant dense<0xFF800000> : vector<4xf32>
    %88 = vector.multi_reduction <maximumf>, %87, %cst_32 [0] : vector<16x4xf32> to vector<4xf32>
    %89 = vector.shape_cast %88 : vector<4xf32> to vector<1x4xf32>
    %cst_33 = arith.constant 1.000000e+00 : f32
    %90 = vector.broadcast %cst_33 : f32 to vector<1x4xf32>
    %91 = arith.subf %90, %89 : vector<1x4xf32>
    %92 = arith.select %22, %89, %91 : vector<1x4xi1>, vector<1x4xf32>
    %cst_34 = arith.constant 9.99999993E-9 : f32
    %93 = vector.broadcast %cst_34 : f32 to vector<1x4xf32>
    %94 = arith.addf %92, %93 : vector<1x4xf32>
    %95 = math.log %94 : vector<1x4xf32>
    %96 = arith.subf %76, %95 : vector<1x4xf32>
    %cst_35 = arith.constant 2.500000e-01 : f32
    %97 = vector.broadcast %cst_35 : f32 to vector<1x4xf32>
    %98 = arith.mulf %96, %97 : vector<1x4xf32>
    %cst_36 = arith.constant 0.000000e+00 : f32
    %99 = vector.broadcast %cst_36 : f32 to vector<1x4xf32>
    %100 = arith.select %5, %98, %99 : vector<1x4xi1>, vector<1x4xf32>
    %cst_37 = arith.constant dense<0.000000e+00> : vector<1xf32>
    %101 = vector.multi_reduction <add>, %100, %cst_37 [1] : vector<1x4xf32> to vector<1xf32>
    %102 = vector.shape_cast %101 : vector<1xf32> to vector<1x1xf32>
    %cst_38 = arith.constant dense<0.000000e+00> : vector<4xf32>
    %103 = vector.multi_reduction <add>, %19, %cst_38 [0] : vector<16x4xf32> to vector<4xf32>
    %104 = vector.shape_cast %103 : vector<4xf32> to vector<1x4xf32>
    %105 = arith.mulf %19, %19 : vector<16x4xf32>
    %cst_39 = arith.constant dense<0.000000e+00> : vector<4xf32>
    %106 = vector.multi_reduction <add>, %105, %cst_39 [0] : vector<16x4xf32> to vector<4xf32>
    %107 = vector.shape_cast %106 : vector<4xf32> to vector<1x4xf32>
    %108 = arith.mulf %104, %104 : vector<1x4xf32>
    %cst_40 = arith.constant 6.250000e-02 : f32
    %109 = vector.broadcast %cst_40 : f32 to vector<1x4xf32>
    %110 = arith.mulf %108, %109 : vector<1x4xf32>
    %111 = arith.subf %107, %110 : vector<1x4xf32>
    %cst_41 = arith.constant 0.000000e+00 : f32
    %112 = vector.broadcast %cst_41 : f32 to vector<1x4xf32>
    %113 = arith.select %25, %111, %112 : vector<1x4xi1>, vector<1x4xf32>
    %cst_42 = arith.constant dense<0.000000e+00> : vector<1xf32>
    %114 = vector.multi_reduction <add>, %113, %cst_42 [1] : vector<1x4xf32> to vector<1xf32>
    %115 = vector.shape_cast %114 : vector<1xf32> to vector<1x1xf32>
    %cst_43 = arith.constant 1.000000e+00 : f32
    %cst_44 = arith.constant 0.000000e+00 : f32
    %116 = vector.broadcast %cst_43 : f32 to vector<1x4xf32>
    %117 = vector.broadcast %cst_44 : f32 to vector<1x4xf32>
    %118 = arith.select %25, %116, %117 : vector<1x4xi1>, vector<1x4xf32>
    %cst_45 = arith.constant dense<0.000000e+00> : vector<1xf32>
    %119 = vector.multi_reduction <add>, %118, %cst_45 [1] : vector<1x4xf32> to vector<1xf32>
    %120 = vector.shape_cast %119 : vector<1xf32> to vector<1x1xf32>
    %cst_46 = arith.constant 2.500000e-01 : f32
    %121 = vector.broadcast %cst_46 : f32 to vector<1x1xf32>
    %122 = arith.mulf %102, %121 : vector<1x1xf32>
    %cst_47 = arith.constant 0.000000e+00 : f32
    %123 = vector.broadcast %cst_47 : f32 to vector<1x1xf32>
    %124 = arith.cmpf ogt, %120, %123 : vector<1x1xf32>
    %cst_48 = arith.constant 1.600000e+01 : f32
    %125 = vector.broadcast %cst_48 : f32 to vector<1x1xf32>
    %126 = arith.mulf %120, %125 : vector<1x1xf32>
    %cst_49 = arith.constant 1.000000e+00 : f32
    %127 = vector.broadcast %cst_49 : f32 to vector<1x1xf32>
    %128 = arith.maximumf %126, %127 : vector<1x1xf32>
    %129 = arith.divf %115, %128 : vector<1x1xf32>
    %cst_50 = arith.constant 0.000000e+00 : f32
    %130 = vector.broadcast %cst_50 : f32 to vector<1x1xf32>
    %131 = arith.select %124, %129, %130 : vector<1x1xi1>, vector<1x1xf32>
    %cst_51 = arith.constant 2.000000e+01 : f32
    %132 = vector.broadcast %cst_51 : f32 to vector<1x1xf32>
    %133 = arith.mulf %132, %131 : vector<1x1xf32>
    %134 = arith.addf %122, %133 : vector<1x1xf32>
    %135 = vector.extract %134[0, 0] : f32 from vector<1x1xf32>
    %c0_52 = arith.constant 0 : index
    %c0_53 = arith.constant 0 : index
    %136 = memref.load %arg5[%c0_52, %c0_53] : memref<1x1xf32, #tpu.memory_space<smem>>
    memref.store %135, %arg5[%c0_52, %c0_53] : memref<1x1xf32, #tpu.memory_space<smem>>
    return
  }
  func.func @transform_0(%arg0: i32) -> (i32, i32) {
    %c0_i32 = arith.constant 0 : i32
    %c0_i32_0 = arith.constant 0 : i32
    return %arg0, %c0_i32 : i32, i32
  }
  func.func @transform_1(%arg0: i32) -> (i32, i32) {
    %c0_i32 = arith.constant 0 : i32
    %c0_i32_0 = arith.constant 0 : i32
    return %c0_i32, %arg0 : i32, i32
  }
  func.func @transform_2(%arg0: i32) -> (i32, i32) {
    %c0_i32 = arith.constant 0 : i32
    %c0_i32_0 = arith.constant 0 : i32
    %c0_i32_1 = arith.constant 0 : i32
    return %c0_i32, %c0_i32_0 : i32, i32
  }
  func.func @transform_3(%arg0: i32) -> (i32, i32) {
    %c0_i32 = arith.constant 0 : i32
    %c0_i32_0 = arith.constant 0 : i32
    %c0_i32_1 = arith.constant 0 : i32
    return %c0_i32, %c0_i32_0 : i32, i32
  }
  func.func @transform_4(%arg0: i32) -> (i32, i32) {
    %c0_i32 = arith.constant 0 : i32
    %c0_i32_0 = arith.constant 0 : i32
    %c0_i32_1 = arith.constant 0 : i32
    return %c0_i32, %c0_i32_0 : i32, i32
  }
}

</mosaic_0001>

<bundles_post_ra>
// kernel: dmil_center_loss.1
= control target key start
LH: loop header
LB: loop body
LE: loop exit
PB: predicated region body
PF: predicated region fallthrough
CT: control target
= control target key end

     0   :  { %v585_v1 = vmov 0.0   ;;  %vm586_vm0 = vmmov 0   ;;  %s726_s0 = inlined_call_operand.vmem [shape: f32[4,16], index: 0, kind: input, shape index: {}]   ;;  %s727_s1 = inlined_call_operand.vmem [shape: f32[1,4], index: 1, kind: input, shape index: {}]   ;;  %s728_s2 = inlined_call_operand.vmem [shape: bf16[16,16], index: 2, kind: input, shape index: {}]   ;;  %s729_s3 = inlined_call_operand.vmem [shape: bf16[16,16], index: 3, kind: input, shape index: {}]   ;;  %s730_s4 = inlined_call_operand.hbm [shape: f32[1,1], index: 4, kind: output, shape index: {}]  }
   0x1   :  { %v27_v0 = vld [vmem:[%s726_s0] sm:$0xf]  ;;  %511 = vmatprep.subr.bf16.mxu0 %v585_v1  ;;  %513 = vmatprep.mubr.msk.bf16.mxu0 %vm586_vm0, %v585_v1 }
   0x2   :  { %v30_v2 = vpack.c.bf16 %v27_v0, %v27_v0  ;;  %529 = vmatprep.subr.bf16.mxu1 %v585_v1  ;;  %531 = vmatprep.mubr.msk.bf16.mxu1 %vm586_vm0, %v585_v1 }
   0x3   :  { %9 = vsyncpa [#allocation3], 0  ;;  %vm42_vm1 = vcmask 130048   ;;  %v561_v9 = vld [vmem:[%s728_s2] sm:$0xff]   ;;  %v23_v13 = vlaneseq  ;;  %vm419_vm5 = vcmask 24576   ;;  %vm186_vm6 = vcmask 31744  }
   0x4   :  { %v31_v3 = vunpack.c.l.bf16 %v30_v2  ;;  %v135_v12 = vsel %vm42_vm1, %v30_v2, 0  ;;  %v643_v15 = vld [vmem:[%s727_s1] sm:$0x1]  ;;  %v587_v55 = vmov 1.0|1.0   ;;  %s573_s22 = scalar_lea.hbm %s730_s4, 16 }
   0x5   :  { %v638_v14 = vand.u32 127, %v23_v13  ;;  %vm182_vm3 = vcmp.eq.f32.partialorder %v643_v15, 0.0  ;;  %vm181_vm7 = vcmp.eq.f32.partialorder %v643_v15, 1.0  ;;  %v669_v52 = vld [vmem:[%s729_s3] sm:$0xff]   ;;  %p574_p0 = scmp.ne.s32.totalorder %s730_s4, %s573_s22  ;;  %p577_p1 = scmp.lt.u32.totalorder %s573_s22, %s730_s4 }
   0x6   :  { %v32_v4 = vsub.f32 %v27_v0, %v31_v3 }
   0x7   :  { %vm26_vm2 = vcmp.lt.s32.totalorder %v638_v14, 4  ;;  %p579_p2 = pnand %p577_p1, %p574_p0 }
   0x8   :  { %v33_v5 = vpack.c.bf16 %v32_v4, %v32_v4  ;;  %vm649_vm4 = vmand %vm26_vm2, %vm182_vm3 }
   0x9   :  { %v450_v17 = vsel %vm649_vm4, 1.0, %v585_v1 }
   0xa   :  { %v34_v6 = vunpack.c.l.bf16 %v33_v5  ;;  %v47_v7 = vsel %vm42_vm1, %v33_v5, 0  ;;  %v451_v18 = vsel %vm419_vm5, %v450_v17, 0.0 }
   0xb   :  { %512 = vmatpush3.bf16.xpose.msra.mxu0 %v47_v7  ;;  %452 = vadd.xlane.f32.xlu0 %v451_v18 }
   0xc   :  { %517 = vmatprep.subr.bf16.mxu0 %v585_v1  ;;  %v35_v8 = vsub.f32 %v32_v4, %v34_v6 }
   0xe   :  { %v36_v10 = vpack.c.bf16 %v35_v8, %v35_v8 }
  0x10   :  { %v91_v11 = vsel %vm42_vm1, %v36_v10, 0 }
  0x12   :  { %514 = vmatmul.mubr.msk.bf16.vlgmr.msra.gmra.mrb[0].mxu0 %vm42_vm1, %v561_v9 }
  0x13   :  { %518 = vmatpush3.bf16.xpose.msra.mxu0 %v91_v11  ;;  %519 = vmatprep.mubr.msk.bf16.mxu0 %vm586_vm0, %v585_v1 }
  0x14   :  { %523 = vmatprep.subr.bf16.mxu0 %v585_v1 }
  0x1e   :  { %520 = vmatmul.mubr.msk.bf16.vlgmr.msra.gmra.mrb[0].mxu0 %vm42_vm1, %v561_v9 }
  0x1f   :  { %524 = vmatpush3.bf16.xpose.msra.mxu0 %v135_v12  ;;  %525 = vmatprep.mubr.msk.bf16.mxu0 %vm586_vm0, %v585_v1 }
  0x2a   :  { %526 = vmatmul.mubr.msk.bf16.vlgmr.msra.gmra.mrb[0].mxu0 %vm42_vm1, %v561_v9 }
  0xfd   :  { %v171_v19 = vpop.f32.mrb[0].mxu0 }
  0xfe   :  { %v432_v20 = vmul.f32 %v171_v19, %v171_v19  ;;  %v527_v21 = vpop.f32.mrb[1].mxu0  ;;  %v187_v22 = vsel %vm186_vm6, %v171_v19, -inf  ;;  %v423_v24 = vsel %vm186_vm6, %v171_v19, 0.0 }
  0xff   :  { %v174_v23 = vpop.f32.mrb[2].mxu0 }
 0x100   :  { %v188_v25 = vsel %vm186_vm6, %v174_v23, -inf  ;;  %v424_v26 = vsel %vm186_vm6, %v174_v23, 0.0  ;;  %v433_v27 = vmul.f32 %v174_v23, %v174_v23  ;;  %v528_v28 = vpop.f32.mrb[3].mxu0  ;;  %v434_v31 = vsel %vm186_vm6, %v432_v20, 0.0 }
 0x101   :  { %v189_v29 = vmax.f32 %v187_v22, %v188_v25  ;;  %v425_v30 = vadd.f32 %v424_v26, %v423_v24 }
 0x102   :  { %v435_v32 = vsel %vm186_vm6, %v433_v27, 0.0 }
 0x103   :  { %v190_v33 = vrot.slane %v189_v29, 4  ;;  %v426_v34 = vrot.slane %v425_v30, 4  ;;  %v436_v35 = vadd.f32 %v435_v32, %v434_v31 }
 0x105   :  { %v191_v36 = vmax.f32 %v189_v29, %v190_v33  ;;  %v427_v37 = vadd.f32 %v426_v34, %v425_v30  ;;  %v437_v38 = vrot.slane %v436_v35, 4 }
 0x107   :  { %v192_v39 = vrot.slane %v191_v36, 2  ;;  %v428_v40 = vrot.slane %v427_v37, 2  ;;  %v438_v41 = vadd.f32 %v437_v38, %v436_v35 }
 0x109   :  { %v193_v42 = vmax.f32 %v191_v36, %v192_v39  ;;  %v429_v43 = vadd.f32 %v428_v40, %v427_v37  ;;  %v439_v44 = vrot.slane %v438_v41, 2 }
 0x10b   :  { %v194_v45 = vrot.slane %v193_v42, 1  ;;  %v430_v46 = vrot.slane %v429_v43, 1  ;;  %v440_v47 = vadd.f32 %v439_v44, %v438_v41 }
 0x10d   :  { %v195_v48 = vmax.f32 %v193_v42, %v194_v45  ;;  %v431_v49 = vadd.f32 %v430_v46, %v429_v43  ;;  %v441_v50 = vrot.slane %v440_v47, 1 }
 0x10f   :  { %v196_v51 = vsub.f32 1.0, %v195_v48  ;;  %vm202_vm8 = vcmp.eq.f32.partialorder %v171_v19, %v195_v48  ;;  %vm203_vm9 = vcmp.eq.f32.partialorder %v174_v23, %v195_v48  ;;  %v443_v53 = vmul.f32 %v431_v49, %v431_v49 }
 0x110   :  { %vm486_vm10 = vmpackc.low %vm203_vm9, %vm202_vm8  ;;  %v442_v56 = vadd.f32 %v441_v50, %v440_v47 }
 0x111   :  { %v197_v54 = vsel %vm181_vm7, %v195_v48, %v196_v51  ;;  %530 = vmatpush3.bf16.msk.msra.mxu1 %vm486_vm10, %v587_v55  ;;  %v444_v57 = vmul.f32 0.0625, %v443_v53 }
 0x112   :  { %535 = vmatprep.subr.bf16.mxu1 %v585_v1  ;;  %v198_v11 = vadd.f32 1e-08, %v197_v54 }
 0x113   :  { %v445_v58 = vsub.f32 %v442_v56, %v444_v57 }
 0x114   :  { %532 = vmatmul.mubr.msk.bf16.vlgmr.msra.gmra.mrb[0].mxu1 %vm42_vm1, %v669_v52  ;;  %563 = vlog2.f32 %v198_v11 }
 0x115   :  { %537 = vmatprep.mubr.msk.bf16.mxu1 %vm586_vm0, %v585_v1  ;;  %v446_v59 = vsel %vm649_vm4, %v445_v58, 0.0 }
 0x116   :  { %v447_v60 = vsel %vm419_vm5, %v446_v59, 0.0 }
 0x117   :  { %448 = vadd.xlane.f32.xlu0 %v447_v60 }
 0x1e7   :  { %v251_v61 = vpop.f32.mrb[0].mxu1 }
 0x1e8   :  { %vm258_vm11 = vcmp.lt.f32.partialorder %v251_v61, 0.5  ;;  %v533_v62 = vpop.f32.mrb[1].mxu1 }
 0x1e9   :  { %vm260_vm12 = vmand %vm202_vm8, %vm258_vm11  ;;  %v254_v63 = vpop.f32.mrb[2].mxu1 }
 0x1ea   :  { %v262_v0 = vsel %vm260_vm12, -1e+30, %v171_v19  ;;  %vm259_vm13 = vcmp.lt.f32.partialorder %v254_v63, 0.5  ;;  %v534_v2 = vpop.f32.mrb[3].mxu1  ;;  %v564_v19 = vpop.eup %563 }
 0x1eb   :  { %vm261_vm14 = vmand %vm203_vm9, %vm259_vm13  ;;  %v264_v4 = vsel %vm186_vm6, %v262_v0, -inf  ;;  %v200_v20 = vmul.f32 0.6931472, %v564_v19 }
 0x1ec   :  { %v263_v3 = vsel %vm261_vm14, -1e+30, %v174_v23 }
 0x1ed   :  { %v265_v5 = vsel %vm186_vm6, %v263_v3, -inf  ;;  %v201_v22 = vsub.f32 0.0, %v200_v20 }
 0x1ee   :  { %v266_v6 = vmax.f32 %v264_v4, %v265_v5 }
 0x1f0   :  { %v267_v7 = vrot.slane %v266_v6, 4 }
 0x1f2   :  { %v268_v8 = vmax.f32 %v266_v6, %v267_v7  ;;  %v453_v6 = vpop.xlane.xlu0 %452 }
 0x1f3   :  { %v456_v7 = vmul.f32 16.0, %v453_v6 }
 0x1f4   :  { %v269_v9 = vrot.slane %v268_v8, 2 }
 0x1f6   :  { %v270_v10 = vmax.f32 %v268_v8, %v269_v9  ;;  %v457_v8 = vmax.f32 %v456_v7, 1.0 }
 0x1f8   :  { %v271_v12 = vrot.slane %v270_v10, 1 }
 0x1fa   :  { %v272_v13 = vmax.f32 %v270_v10, %v271_v12  ;;  %v449_v10 = vpop.xlane.xlu0 %448 }
 0x1fc   :  { %vm280_vm15 = vcmp.eq.f32.partialorder %v263_v3, %v272_v13  ;;  %vm279_vm3 = vcmp.eq.f32.partialorder %v262_v0, %v272_v13  ;;  %v273_v16 = vsub.f32 1.0, %v272_v13 }
 0x1fd   :  { %vm491_vm4 = vmpackc.low %vm280_vm15, %vm279_vm3 }
 0x1fe   :  { %536 = vmatpush3.bf16.msk.msra.mxu1 %vm491_vm4, %v587_v55  ;;  %v274_v17 = vsel %vm181_vm7, %v272_v13, %v273_v16 }
 0x1ff   :  { %541 = vmatprep.subr.bf16.mxu1 %v585_v1  ;;  %v275_v18 = vadd.f32 1e-08, %v274_v17 }
 0x201   :  { %538 = vmatmul.mubr.msk.bf16.vlgmr.msra.gmra.mrb[4].mxu1 %vm42_vm1, %v669_v52  ;;  %565 = vlog2.f32 %v275_v18 }
 0x202   :  { %543 = vmatprep.mubr.msk.bf16.mxu1 %vm586_vm0, %v585_v1 }
 0x20b   :  { %v566_v21 = vpop.eup %565 }
 0x20c   :  { %v277_v23 = vmul.f32 0.6931472, %v566_v21 }
 0x20e   :  { %v278_v24 = vsub.f32 %v201_v22, %v277_v23 }
 0x2d4   :  { %v320_v25 = vpop.f32.mrb[4].mxu1 }
 0x2d5   :  { %vm327_vm8 = vcmp.lt.f32.partialorder %v320_v25, 0.5  ;;  %v539_v26 = vpop.f32.mrb[5].mxu1 }
 0x2d6   :  { %vm329_vm9 = vmand %vm279_vm3, %vm327_vm8  ;;  %v323_v27 = vpop.f32.mrb[6].mxu1 }
 0x2d7   :  { %v331_v28 = vsel %vm329_vm9, -1e+30, %v262_v0  ;;  %vm328_vm10 = vcmp.lt.f32.partialorder %v323_v27, 0.5  ;;  %v540_v29 = vpop.f32.mrb[7].mxu1 }
 0x2d8   :  { %vm330_vm11 = vmand %vm280_vm15, %vm328_vm10  ;;  %v333_v1 = vsel %vm186_vm6, %v331_v28, -inf }
 0x2d9   :  { %v332_v30 = vsel %vm330_vm11, -1e+30, %v263_v3 }
 0x2da   :  { %v334_v31 = vsel %vm186_vm6, %v332_v30, -inf }
 0x2db   :  { %v335_v32 = vmax.f32 %v333_v1, %v334_v31 }
 0x2dd   :  { %v336_v33 = vrot.slane %v335_v32, 4 }
 0x2df   :  { %v337_v34 = vmax.f32 %v335_v32, %v336_v33 }
 0x2e1   :  { %v338_v35 = vrot.slane %v337_v34, 2 }
 0x2e3   :  { %v339_v36 = vmax.f32 %v337_v34, %v338_v35 }
 0x2e5   :  { %v340_v37 = vrot.slane %v339_v36, 1 }
 0x2e7   :  { %v341_v38 = vmax.f32 %v339_v36, %v340_v37 }
 0x2e9   :  { %vm349_vm0 = vcmp.eq.f32.partialorder %v332_v30, %v341_v38  ;;  %vm348_vm12 = vcmp.eq.f32.partialorder %v331_v28, %v341_v38  ;;  %v342_v39 = vsub.f32 1.0, %v341_v38 }
 0x2ea   :  { %vm496_vm13 = vmpackc.low %vm349_vm0, %vm348_vm12 }
 0x2eb   :  { %542 = vmatpush3.bf16.msk.msra.mxu1 %vm496_vm13, %v587_v55  ;;  %v343_v40 = vsel %vm181_vm7, %v341_v38, %v342_v39 }
 0x2ec   :  { %v344_v41 = vadd.f32 1e-08, %v343_v40 }
 0x2ee   :  { %544 = vmatmul.mubr.msk.bf16.vlgmr.msra.gmra.mrb[8].mxu1 %vm42_vm1, %v669_v52  ;;  %567 = vlog2.f32 %v344_v41  ;;  %vm455_vm1 = vcmp.gt.f32.partialorder %v453_v6, 0.0 }
 0x2f8   :  { %v568_v42 = vpop.eup %567 }
 0x2f9   :  { %v346_v43 = vmul.f32 0.6931472, %v568_v42 }
 0x2fb   :  { %v347_v44 = vsub.f32 %v278_v24, %v346_v43 }
 0x3c1   :  { %v389_v45 = vpop.f32.mrb[8].mxu1 }
 0x3c2   :  { %vm396_vm14 = vcmp.lt.f32.partialorder %v389_v45, 0.5  ;;  %v545_v46 = vpop.f32.mrb[9].mxu1 }
 0x3c3   :  { %vm398_vm15 = vmand %vm348_vm12, %vm396_vm14  ;;  %v392_v47 = vpop.f32.mrb[10].mxu1 }
 0x3c4   :  { %v400_v48 = vsel %vm398_vm15, -1e+30, %v331_v28  ;;  %vm397_vm3 = vcmp.lt.f32.partialorder %v392_v47, 0.5  ;;  %v546_v49 = vpop.f32.mrb[11].mxu1 }
 0x3c5   :  { %vm399_vm4 = vmand %vm349_vm0, %vm397_vm3  ;;  %v402_v51 = vsel %vm186_vm6, %v400_v48, -inf }
 0x3c6   :  { %v401_v50 = vsel %vm399_vm4, -1e+30, %v332_v30 }
 0x3c7   :  { %v403_v53 = vsel %vm186_vm6, %v401_v50, -inf }
 0x3c8   :  { %v404_v52 = vmax.f32 %v402_v51, %v403_v53 }
 0x3ca   :  { %v405_v54 = vrot.slane %v404_v52, 4 }
 0x3cc   :  { %v406_v55 = vmax.f32 %v404_v52, %v405_v54 }
 0x3ce   :  { %v407_v56 = vrot.slane %v406_v55, 2 }
 0x3d0   :  { %v408_v57 = vmax.f32 %v406_v55, %v407_v56 }
 0x3d2   :  { %v409_v58 = vrot.slane %v408_v57, 1 }
 0x3d4   :  { %v410_v59 = vmax.f32 %v408_v57, %v409_v58 }
 0x3d6   :  { %v411_v60 = vsub.f32 1.0, %v410_v59 }
 0x3d8   :  { %v412_v61 = vsel %vm181_vm7, %v410_v59, %v411_v60 }
 0x3d9   :  { %v413_v62 = vadd.f32 1e-08, %v412_v61 }
 0x3db   :  { %569 = vlog2.f32 %v413_v62 }
 0x3dc   :  { %571 = vrcp.f32 %v457_v8 }
 0x3e5   :  { %v570_v63 = vpop.eup %569 }
 0x3e6   :  { %v415_v0 = vmul.f32 0.6931472, %v570_v63  ;;  %v572_v9 = vpop.eup %571 }
 0x3e7   :  { %v459_v15 = vmul.f32 %v572_v9, %v449_v10 }
 0x3e8   :  { %v416_v2 = vsub.f32 %v347_v44, %v415_v0 }
 0x3e9   :  { %v460_v11 = vsel %vm455_vm1, %v459_v15, 0.0 }
 0x3ea   :  { %v417_v3 = vmul.f32 0.25, %v416_v2  ;;  %v461_v16 = vmul.f32 20.0, %v460_v11 }
 0x3ec   :  { %v418_v4 = vsel %vm26_vm2, %v417_v3, 0.0 }
 0x3ed   :  { %v420_v5 = vsel %vm419_vm5, %v418_v4, 0.0 }
 0x3ee   :  { %421 = vadd.xlane.f32.xlu1 %v420_v5 }
 0x47b   :  { %v422_v12 = vpop.xlane.xlu1 %421 }
 0x47c   :  { %v454_v13 = vmul.f32 0.25, %v422_v12 }
 0x47e   :  { %v462_v17 = vadd.f32 %v461_v16, %v454_v13 }
 0x480   :  { %555 = vpush %v462_v17 }
 0x4b1   :  { %s556_s3 = spop %555 }
 0x4b2   :  { %465 = sst [smem:[#allocation2]] %s556_s3 }
 0x4b3   :  { %582 = shalt.err (!%p579_p2)
}
 0x4b4   :  { %s588_s27 = smov [#allocation2]  }
 0x4b5   :  { %473 = dma.smem_to_hbm %s588_s27, 16, %s730_s4, [#allocation3]  }
 0x4b6   :  { %583 = dma.done.wait [#allocation3], 16  }
 0x4b7   :  { %584 = vsyncadd [#allocation3], 4294967280 }
 0x4b8   :  { %477 = sfence }
 0x4b9   :  { %478 = vsyncpa [#allocation3], 1 }

</bundles_post_ra>
